<compile_context>
chip_gen: v5e
topology: v5e:2x2
jax: 0.10.0
libtpu: 0.0.40
codegen_flags: <defaults>
</compile_context>

<pallas_src>
import math
import functools

import jax
import jax.numpy as jnp
from jax.experimental import pallas as pl
from jax.experimental.pallas import tpu as pltpu


def _round_up(x, m):
    return ((x + m - 1) // m) * m


def _fourier_kernel(x_ref, b_ref, out_ref):
    # x_ref:   (tile_rows, C)         input rows
    # b_ref:   (C, M_pad)             2*pi-scaled projection, VMEM-resident
    # out_ref: (tile_rows, 2*M_pad)   [ sin | cos ] slabs (lane-aligned split)
    x = x_ref[...]
    b = b_ref[...]
    C = b.shape[0]
    m_pad = b.shape[1]

    if C <= 16:
        # Tiny contraction dim: a short unrolled broadcast-FMA chain on the
        # VPU beats a <1%-utilized MXU pass and frees the vector-extended slot.
        ang = x[:, 0:1] * b[0:1, :]
        for c in range(1, C):
            ang = ang + x[:, c:c + 1] * b[c:c + 1, :]
    else:
        ang = jnp.dot(x, b, preferred_element_type=jnp.float32)

    # Direct lane-aligned slab stores; no concatenate temporary in the store
    # path.  Transcendentals stay in f32; cast only at the store.
    out_ref[:, :m_pad] = jnp.sin(ang).astype(out_ref.dtype)
    out_ref[:, m_pad:] = jnp.cos(ang).astype(out_ref.dtype)


@functools.partial(jax.jit, static_argnames=("tile_rows",))
def fourier_feature_transform(x, b_mat, *, tile_rows=512):
    """x: (B, N, C) float32; b_mat: (C, M) float32 -> (B, N, 2*M)."""
    B, N, C = x.shape
    C2, M = b_mat.shape
    assert C == C2
    BN = B * N

    # Lane-dense mapping width: pad M up to a multiple of 128 so both slabs
    # are unmasked full-lane stores and the sin/cos split is lane-aligned.
    M_pad = _round_up(M, 128)

    # Cap the row tile so double-buffered f32 input+output tiles stay well
    # under the scoped-VMEM budget (v7x has only half the VMEM of v5e/v6e).
    vmem_budget = 24 * 1024 * 1024
    bytes_per_row = 2 * (C + 2 * M_pad) * 4  # double-buffered in + out, f32
    max_rows = max(8, (vmem_budget // bytes_per_row) // 8 * 8)
    tile_rows = min(tile_rows, max_rows)

    # Don't tile wider than the (padded) row count for small inputs; keep the
    # sublane (8) alignment.
    tile_rows = max(8, _round_up(min(tile_rows, BN), 8))
    BN_pad = _round_up(BN, tile_rows)

    # Fold the 2*pi angular scale into the frozen projection matrix once
    # (a weight, not an activation), and zero-pad the mapping dim.
    b_scaled = b_mat.astype(jnp.float32) * (2.0 * math.pi)
    if M_pad != M:
        b_scaled = jnp.pad(b_scaled, ((0, 0), (0, M_pad - M)))

    x_flat = x.reshape(BN, C).astype(jnp.float32)
    if BN_pad != BN:
        x_flat = jnp.pad(x_flat, ((0, BN_pad - BN), (0, 0)))

    out_flat = pl.pallas_call(
        _fourier_kernel,
        out_shape=jax.ShapeDtypeStruct((BN_pad, 2 * M_pad), x.dtype),
        grid_spec=pltpu.PrefetchScalarGridSpec(
            num_scalar_prefetch=0,
            grid=(BN_pad // tile_rows,),
            in_specs=[
                pl.BlockSpec((tile_rows, C), lambda i: (i, 0)),
                # Constant block index -> projection matrix held resident in
                # VMEM across all grid steps (no per-step re-DMA).
                pl.BlockSpec((C, M_pad), lambda i: (0, 0)),
            ],
            out_specs=pl.BlockSpec((tile_rows, 2 * M_pad), lambda i: (i, 0)),
        ),
        compiler_params=pltpu.CompilerParams(
            dimension_semantics=("parallel",),
            vmem_limit_bytes=64 * 1024 * 1024,
        ),
    )(x_flat, b_scaled)

    out_flat = out_flat[:BN]
    if M_pad == M:
        return out_flat.reshape(B, N, 2 * M)
    sin_part = out_flat[:, :M]
    cos_part = out_flat[:, M_pad:M_pad + M]
    return jnp.concatenate([sin_part, cos_part], axis=-1).reshape(B, N, 2 * M)


def fourier_feature_transform_ref(x, b_mat):
    B, N, C = x.shape
    proj = (x.reshape(B * N, C) @ b_mat).reshape(B, N, -1)
    ang = 2.0 * math.pi * proj
    return jnp.concatenate([jnp.sin(ang), jnp.cos(ang)], axis=-1)


if __name__ == "__main__":
    # Module config (matches nn.Module __init__): num_input_channels=C,
    # mapping_size=M, scale=10. Parameter B ~ N(0, 1) * scale, frozen.
    Bsz, N, C, M = 2, 8, 4, 32
    scale = 10.0

    key = jax.random.PRNGKey(0)
    k_x, k_b = jax.random.split(key)
    x = jax.random.normal(k_x, (Bsz, N, C), dtype=jnp.float32)
    b_mat = jax.random.normal(k_b, (C, M), dtype=jnp.float32) * scale

    out = fourier_feature_transform(x, b_mat)
    out = jax.block_until_ready(out)

    ref = fourier_feature_transform_ref(x, b_mat)
    assert out.shape == (Bsz, N, 2 * M)
    assert jnp.allclose(out, ref, atol=5e-4, rtol=5e-4)

    print("KERNEL_OK")
</pallas_src>

<mosaic_0001>
module attributes {stable_mosaic.version = 11 : i64} {
  func.func @_fourier_kernel(%arg0: i32, %arg1: memref<16x4xf32, #tpu.memory_space<vmem>>, %arg2: memref<4x128xf32, #tpu.memory_space<vmem>>, %arg3: memref<16x256xf32, #tpu.memory_space<vmem>>) attributes {dimension_semantics = [#tpu.dimension_semantics<parallel>], iteration_bounds = array<i64: 1>, scalar_prefetch = 0 : i64, scratch_operands = 0 : i64, tpu.core_type = #tpu.core_type<tc>, window_params = [{transform_indices = @transform_0, window_bounds = array<i64: 16, 4>}, {pipeline_mode = #tpu.pipeline_mode<synchronous>, transform_indices = @transform_1, window_bounds = array<i64: 4, 128>}, {transform_indices = @transform_2, window_bounds = array<i64: 16, 256>}]} {
    %c0 = arith.constant 0 : index
    %c0_0 = arith.constant 0 : index
    %0 = vector.load %arg1[%c0, %c0_0] : memref<16x4xf32, #tpu.memory_space<vmem>>, vector<16x4xf32>
    %c0_1 = arith.constant 0 : index
    %c0_2 = arith.constant 0 : index
    %1 = vector.load %arg2[%c0_1, %c0_2] : memref<4x128xf32, #tpu.memory_space<vmem>>, vector<4x128xf32>
    %2 = vector.extract_strided_slice %0 {offsets = [0, 0], sizes = [16, 1], strides = [1, 1]} : vector<16x4xf32> to vector<16x1xf32>
    %3 = vector.extract_strided_slice %1 {offsets = [0, 0], sizes = [1, 128], strides = [1, 1]} : vector<4x128xf32> to vector<1x128xf32>
    %4 = vector.broadcast %2 : vector<16x1xf32> to vector<16x128xf32>
    %5 = vector.broadcast %3 : vector<1x128xf32> to vector<16x128xf32>
    %6 = arith.mulf %4, %5 : vector<16x128xf32>
    %7 = vector.extract_strided_slice %0 {offsets = [0, 1], sizes = [16, 1], strides = [1, 1]} : vector<16x4xf32> to vector<16x1xf32>
    %8 = vector.extract_strided_slice %1 {offsets = [1, 0], sizes = [1, 128], strides = [1, 1]} : vector<4x128xf32> to vector<1x128xf32>
    %9 = vector.broadcast %7 : vector<16x1xf32> to vector<16x128xf32>
    %10 = vector.broadcast %8 : vector<1x128xf32> to vector<16x128xf32>
    %11 = arith.mulf %9, %10 : vector<16x128xf32>
    %12 = arith.addf %6, %11 : vector<16x128xf32>
    %13 = vector.extract_strided_slice %0 {offsets = [0, 2], sizes = [16, 1], strides = [1, 1]} : vector<16x4xf32> to vector<16x1xf32>
    %14 = vector.extract_strided_slice %1 {offsets = [2, 0], sizes = [1, 128], strides = [1, 1]} : vector<4x128xf32> to vector<1x128xf32>
    %15 = vector.broadcast %13 : vector<16x1xf32> to vector<16x128xf32>
    %16 = vector.broadcast %14 : vector<1x128xf32> to vector<16x128xf32>
    %17 = arith.mulf %15, %16 : vector<16x128xf32>
    %18 = arith.addf %12, %17 : vector<16x128xf32>
    %19 = vector.extract_strided_slice %0 {offsets = [0, 3], sizes = [16, 1], strides = [1, 1]} : vector<16x4xf32> to vector<16x1xf32>
    %20 = vector.extract_strided_slice %1 {offsets = [3, 0], sizes = [1, 128], strides = [1, 1]} : vector<4x128xf32> to vector<1x128xf32>
    %21 = vector.broadcast %19 : vector<16x1xf32> to vector<16x128xf32>
    %22 = vector.broadcast %20 : vector<1x128xf32> to vector<16x128xf32>
    %23 = arith.mulf %21, %22 : vector<16x128xf32>
    %24 = arith.addf %18, %23 : vector<16x128xf32>
    %25 = math.sin %24 : vector<16x128xf32>
    %c0_3 = arith.constant 0 : index
    %c0_4 = arith.constant 0 : index
    %26 = vector.load %arg3[%c0_3, %c0_4] : memref<16x256xf32, #tpu.memory_space<vmem>>, vector<16x128xf32>
    tpu.vector_store %arg3[%c0_3, %c0_4], %25 {strides = array<i32>} : memref<16x256xf32, #tpu.memory_space<vmem>>, vector<16x128xf32>,
    %27 = math.cos %24 : vector<16x128xf32>
    %c0_5 = arith.constant 0 : index
    %c128 = arith.constant 128 : index
    %28 = vector.load %arg3[%c0_5, %c128] : memref<16x256xf32, #tpu.memory_space<vmem>>, vector<16x128xf32>
    tpu.vector_store %arg3[%c0_5, %c128], %27 {strides = array<i32>} : memref<16x256xf32, #tpu.memory_space<vmem>>, vector<16x128xf32>,
    return
  }
  func.func @transform_0(%arg0: i32) -> (i32, i32) {
    %c0_i32 = arith.constant 0 : i32
    %c0_i32_0 = arith.constant 0 : i32
    return %arg0, %c0_i32 : i32, i32
  }
  func.func @transform_1(%arg0: i32) -> (i32, i32) {
    %c0_i32 = arith.constant 0 : i32
    %c0_i32_0 = arith.constant 0 : i32
    %c0_i32_1 = arith.constant 0 : i32
    return %c0_i32, %c0_i32_0 : i32, i32
  }
  func.func @transform_2(%arg0: i32) -> (i32, i32) {
    %c0_i32 = arith.constant 0 : i32
    %c0_i32_0 = arith.constant 0 : i32
    return %arg0, %c0_i32 : i32, i32
  }
}

</mosaic_0001>

<bundles_post_ra>
// kernel: fourier_feature_transform.1
= control target key start
LH: loop header
LB: loop body
LE: loop exit
PB: predicated region body
PF: predicated region fallthrough
CT: control target
= control target key end

     0   :  { %v719_v0 = vmov 1   ;;  %v720_v1 = vmov 0   ;;  %v721_v3 = vmov 2   ;;  %v722_v5 = vmov 3   ;;  %s949_s0 = inlined_call_operand.vmem [shape: f32[16,4], index: 0, kind: input, shape index: {}]   ;;  %s950_s1 = inlined_call_operand.vmem [shape: f32[4,128], index: 1, kind: input, shape index: {}]   ;;  %s951_s2 = inlined_call_operand.vmem [shape: f32[16,256], index: 2, kind: output, shape index: {}]  }
   0x1   :  { %715 = vset.pattern.permute.xlu1 %v719_v0  ;;  %714 = vset.pattern.permute.xlu0 %v720_v1  ;;  %v11_v2 = vld [vmem:[%s949_s0] sm:$0xff]  ;;  %v12_v4 = vld [vmem:[%s949_s0 + $0x8] sm:$0xff]  ;;  %v723_v56 = vmov 683565275   ;;  %v724_v58 = vmov 2475754826  }
   0x2   :  { %28 = vperm.xlu1 %715, %v11_v2   ;;  %16 = vperm.xlu0 %714, %v11_v2   ;;  %v13_v8 = vld [vmem:[%s950_s1] sm:$0xf]  ;;  %v725_v62 = vmov 2131351028  }
   0x3   :  { %716 = vset.pattern.permute.xlu2 %v721_v3  ;;  %v35_v10 = vperm.slane %v13_v8, 1  ;;  %v24_v11 = vperm.slane %v13_v8, 0  ;;  %v48_v14 = vperm.slane %v13_v8, 2  ;;  %v61_v23 = vperm.slane %v13_v8, 3 }
   0x4   :  { %41 = vperm.xlu2 %716, %v11_v2   ;;  %v728_v8 = vmov 1326507024  }
   0xa   :  { %32 = vperm.xlu1 %715, %v12_v4   ;;  %21 = vperm.xlu0 %714, %v12_v4  }
   0xc   :  { %45 = vperm.xlu2 %716, %v12_v4  }
  0x12   :  { %718 = vset.pattern.permute.xlu1 %v722_v5  ;;  %717 = vset.pattern.permute.xlu0 %v722_v5  ;;  %v727_v5 = vmov 920167782  }
  0x13   :  { %58 = vperm.xlu1 %718, %v12_v4   ;;  %54 = vperm.xlu0 %717, %v11_v2   ;;  %v726_v2 = vmov 2102212464  }
  0x5e   :  { %v42_v9 = vpop.permute.xlu2 %41 }
  0x5f   :  { %v49_v20 = vmul.f32 %v48_v14, %v42_v9 }
  0x66   :  { %v46_v19 = vpop.permute.xlu2 %45 }
  0x67   :  { %v50_v24 = vmul.f32 %v48_v14, %v46_v19 }
  0x74   :  { %v29_v6 = vpop.permute.xlu1 %28  ;;  %v17_v7 = vpop.permute.xlu0 %16 }
  0x75   :  { %v36_v15 = vmul.f32 %v35_v10, %v29_v6  ;;  %v25_v16 = vmul.f32 %v24_v11, %v17_v7 }
  0x77   :  { %v38_v21 = vadd.f32 %v36_v15, %v25_v16 }
  0x79   :  { %v51_v29 = vadd.f32 %v49_v20, %v38_v21 }
  0x7c   :  { %v33_v12 = vpop.permute.xlu1 %32  ;;  %v22_v13 = vpop.permute.xlu0 %21 }
  0x7d   :  { %v37_v17 = vmul.f32 %v35_v10, %v33_v12  ;;  %v26_v18 = vmul.f32 %v24_v11, %v22_v13 }
  0x7f   :  { %v39_v22 = vadd.f32 %v37_v17, %v26_v18 }
  0x81   :  { %v52_v27 = vadd.f32 %v50_v24, %v39_v22 }
  0x85   :  { %v59_v25 = vpop.permute.xlu1 %58  ;;  %v55_v26 = vpop.permute.xlu0 %54 }
  0x86   :  { %v63_v28 = vmul.f32 %v61_v23, %v59_v25  ;;  %v62_v30 = vmul.f32 %v61_v23, %v55_v26 }
  0x88   :  { %v754_v31 = vadd.f32 %v63_v28, %v52_v27  ;;  %v756_v32 = vadd.f32 %v62_v30, %v51_v29 }
  0x8a   :  { %v221_v33 = vand.u32 2147483647, %v754_v31  ;;  %v224_v34 = vand.u32 2139095040, %v754_v31  ;;  %v66_v35 = vand.u32 2147483647, %v756_v32  ;;  %v69_v36 = vand.u32 2139095040, %v756_v32 }
  0x8c   :  { %v225_v37 = vshrl.u32 %v224_v34, 23  ;;  %v228_v38 = vand.u32 8388607, %v221_v33  ;;  %v70_v39 = vshrl.u32 %v69_v36, 23  ;;  %v73_v42 = vand.u32 8388607, %v66_v35 }
  0x8e   :  { %v695_v40 = vadd.s32 4294967169, %v225_v37  ;;  %v229_v41 = vor.u32 8388608, %v228_v38  ;;  %v692_v43 = vadd.s32 4294967169, %v70_v39  ;;  %v74_v47 = vor.u32 8388608, %v73_v42 }
  0x90   :  { %v231_v44 = vadd.s32 1, %v695_v40  ;;  %v76_v45 = vadd.s32 1, %v692_v43  ;;  %v766_v46 = vshll.u32 %v229_v41, 8  ;;  %v773_v54 = vshll.u32 %v74_v47, 8 }
  0x92   :  { %vm232_vm0 = vcmp.gt.s32.totalorder %v231_v44, 0  ;;  %vm77_vm1 = vcmp.gt.s32.totalorder %v76_v45, 0  ;;  %v769_v52 = vand.u32 65535, %v766_v46  ;;  %v271_v60 = vshrl.u32 %v766_v46, 16 }
  0x93   :  { %v233_v48 = vsel %vm232_vm0, %v231_v44, 0  ;;  %v78_v50 = vsel %vm77_vm1, %v76_v45, 0 }
  0x94   :  { %v235_v49 = vand.u32 31, %v233_v48  ;;  %v771_v53 = vand.u32 31, %v78_v50  ;;  %v775_v55 = vshrl.u32 %v233_v48, 5  ;;  %v813_v40 = vshrl.u32 %v78_v50, 5 }
  0x96   :  { %v236_v51 = vsub.s32 32, %v235_v49  ;;  %v238_v57 = vshll.u32 %v723_v56, %v235_v49  ;;  %v241_v59 = vshll.u32 %v724_v58, %v235_v49  ;;  %v244_v0 = vshll.u32 %v725_v62, %v235_v49 }
  0x97   :  { %v247_v4 = vshll.u32 %v726_v2, %v235_v49  ;;  %v250_v7 = vshll.u32 %v727_v5, %v235_v49  ;;  %v785_v13 = vsub.s32 32, %v771_v53  ;;  %vm253_vm2 = vcmp.lt.s32.totalorder %v775_v55, 1 }
  0x98   :  { %v239_v61 = vshrl.u32 %v724_v58, %v236_v51  ;;  %v242_v63 = vshrl.u32 %v725_v62, %v236_v51  ;;  %v245_v3 = vshrl.u32 %v726_v2, %v236_v51  ;;  %v248_v6 = vshrl.u32 %v727_v5, %v236_v51 }
  0x99   :  { %v251_v9 = vshrl.u32 %v728_v8, %v236_v51  ;;  %vm254_vm3 = vcmp.lt.s32.totalorder %v775_v55, 2  ;;  %v237_v16 = vshrl.u32 %v723_v56, %v236_v51  ;;  %vm256_vm4 = vcmp.lt.s32.totalorder %v775_v55, 4 }
  0x9a   :  { %v240_v10 = vor.u32 %v239_v61, %v238_v57  ;;  %v243_v11 = vor.u32 %v242_v63, %v241_v59  ;;  %v246_v12 = vor.u32 %v245_v3, %v244_v0  ;;  %v249_v14 = vor.u32 %v248_v6, %v247_v4 }
  0x9b   :  { %v252_v15 = vor.u32 %v251_v9, %v250_v7  ;;  %vm255_vm5 = vcmp.lt.s32.totalorder %v775_v55, 3  ;;  %v83_v21 = vshll.u32 %v723_v56, %v771_v53  ;;  %v84_v25 = vshrl.u32 %v724_v58, %v785_v13 }
  0x9c   :  { %v261_v17 = vsel %vm253_vm2, %v240_v10, %v243_v11  ;;  %v265_v18 = vsel %vm253_vm2, %v243_v11, %v246_v12  ;;  %v262_v19 = vsel %vm256_vm4, %v249_v14, 920167782  ;;  %v258_v22 = vsel %vm256_vm4, %v246_v12, 2102212464 }
  0x9d   :  { %v266_v20 = vsel %vm256_vm4, %v252_v15, 1326507024  ;;  %v263_v23 = vsel %vm255_vm5, %v246_v12, %v262_v19  ;;  %v86_v28 = vshll.u32 %v724_v58, %v771_v53  ;;  %v87_v29 = vshrl.u32 %v725_v62, %v785_v13 }
  0x9e   :  { %v267_v24 = vsel %vm255_vm5, %v249_v14, %v266_v20  ;;  %v264_v26 = vsel %vm254_vm3, %v261_v17, %v263_v23  ;;  %v257_v38 = vsel %vm253_vm2, %v237_v16, %v240_v10  ;;  %v259_v39 = vsel %vm255_vm5, %v243_v11, %v258_v22 }
  0x9f   :  { %v268_v27 = vsel %vm254_vm3, %v265_v18, %v267_v24  ;;  %v294_v36 = vand.u32 65535, %v264_v26  ;;  %v295_v37 = vshrl.u32 %v264_v26, 16  ;;  %v815_v41 = vor.u32 %v84_v25, %v83_v21 }
  0xa0   :  { %v272_v30 = vand.u32 65535, %v268_v27  ;;  %v273_v34 = vshrl.u32 %v268_v27, 16  ;;  %v818_v44 = vor.u32 %v87_v29, %v86_v28  ;;  %v90_v45 = vshrl.u32 %v726_v2, %v785_v13 }
  0xa1   :  { %v297_v48 = vmul.u32 %v295_v37, %v769_v52  ;;  %v298_v49 = vmul.u32 %v294_v36, %v271_v60  ;;  %v89_v51 = vshll.u32 %v725_v62, %v771_v53  ;;  %v296_v58 = vmul.u32 %v294_v36, %v769_v52 }
  0xa2   :  { %v275_v42 = vmul.u32 %v273_v34, %v769_v52  ;;  %v276_v43 = vmul.u32 %v272_v30, %v271_v60  ;;  %v274_v47 = vmul.u32 %v272_v30, %v769_v52  ;;  %v277_v57 = vmul.u32 %v273_v34, %v271_v60 }
  0xa3   :  { %v299_v59 = vmul.u32 %v295_v37, %v271_v60  ;;  %v300_v3 = vshll.u32 %v297_v48, 16  ;;  %v302_v6 = vshll.u32 %v298_v49, 16  ;;  %v826_v7 = vor.u32 %v90_v45, %v89_v51 }
  0xa4   :  { %v278_v50 = vshll.u32 %v275_v42, 16  ;;  %v279_v61 = vshrl.u32 %v275_v42, 16  ;;  %v280_v63 = vshll.u32 %v276_v43, 16  ;;  %v281_v0 = vshrl.u32 %v276_v43, 16 }
  0xa5   :  { %vm304_vm7 = vc.u32 %v296_v58, %v300_v3  ;;  %v306_v10 = vadd.s32 %v300_v3, %v296_v58  ;;  %v93_v62 = vshrl.u32 %v727_v5, %v785_v13  ;;  %v92_v60 = vshll.u32 %v726_v2, %v771_v53 }
  0xa6   :  { %vm282_vm6 = vc.u32 %v274_v47, %v278_v50  ;;  %v284_v4 = vadd.s32 %v278_v50, %v274_v47  ;;  %v305_v52 = vsel %vm304_vm7, 1, %v720_v1  ;;  %v95_v15 = vshll.u32 %v727_v5, %v771_v53 }
  0xa7   :  { %v283_v9 = vsel %vm282_vm6, 1, %v720_v1  ;;  %v307_v14 = vadd.s32 %v305_v52, %v299_v59  ;;  %vm308_vm9 = vc.u32 %v306_v10, %v302_v6  ;;  %v94_v18 = vor.u32 %v93_v62, %v92_v60 }
  0xa8   :  { %v285_v11 = vadd.s32 %v283_v9, %v277_v57  ;;  %vm286_vm8 = vc.u32 %v284_v4, %v280_v63  ;;  %v309_v17 = vsel %vm308_vm9, 1, %v720_v1  ;;  %v96_v19 = vshrl.u32 %v728_v8, %v785_v13 }
  0xa9   :  { %v287_v12 = vsel %vm286_vm8, 1, %v720_v1  ;;  %v301_v20 = vshrl.u32 %v297_v48, 16  ;;  %v303_v21 = vshrl.u32 %v298_v49, 16  ;;  %v840_v22 = vadd.s32 %v306_v10, %v302_v6 }
  0xaa   :  { %v289_v16 = vadd.s32 %v287_v12, %v285_v11  ;;  %v311_v23 = vadd.s32 %v309_v17, %v307_v14  ;;  %v97_v24 = vor.u32 %v96_v19, %v95_v15  ;;  %vm98_vm10 = vcmp.lt.s32.totalorder %v813_v40, 1 }
  0xab   :  { %vm101_vm11 = vcmp.lt.s32.totalorder %v813_v40, 4  ;;  %vm100_vm12 = vcmp.lt.s32.totalorder %v813_v40, 3  ;;  %v106_v53 = vsel %vm98_vm10, %v815_v41, %v818_v44  ;;  %vm99_vm13 = vcmp.lt.s32.totalorder %v813_v40, 2 }
  0xac   :  { %v290_v2 = vadd.s32 %v289_v16, %v279_v61  ;;  %v312_v25 = vadd.s32 %v311_v23, %v301_v20  ;;  %v107_v5 = vsel %vm101_vm11, %v94_v18, 920167782  ;;  %v110_v27 = vsel %vm98_vm10, %v818_v44, %v826_v7 }
  0xad   :  { %v108_v26 = vsel %vm100_vm12, %v826_v7, %v107_v5  ;;  %v260_v28 = vsel %vm254_vm3, %v257_v38, %v259_v39  ;;  %v111_v34 = vsel %vm101_vm11, %v97_v24, 1326507024  ;;  %v115_v37 = vand.u32 65535, %v773_v54 }
  0xae   :  { %v851_v8 = vadd.s32 %v290_v2, %v281_v0  ;;  %v313_v29 = vadd.s32 %v312_v25, %v303_v21  ;;  %v109_v30 = vsel %vm99_vm13, %v106_v53, %v108_v26  ;;  %v112_v36 = vsel %vm100_vm12, %v94_v18, %v111_v34 }
  0xaf   :  { %v139_v42 = vand.u32 65535, %v109_v30  ;;  %v113_v55 = vsel %vm99_vm13, %v110_v27, %v112_v36  ;;  %v116_v38 = vshrl.u32 %v773_v54, 16  ;;  %v140_v39 = vshrl.u32 %v109_v30, 16 }
  0xb0   :  { %vm316_vm14 = vc.u32 %v851_v8, %v840_v22  ;;  %v317_v43 = vadd.s32 1, %v313_v29  ;;  %v314_v45 = vmul.u32 %v766_v46, %v260_v28  ;;  %v117_v47 = vand.u32 65535, %v113_v55 }
  0xb1   :  { %v118_v48 = vshrl.u32 %v113_v55, 16  ;;  %v142_v51 = vmul.u32 %v140_v39, %v115_v37  ;;  %v143_v57 = vmul.u32 %v139_v42, %v116_v38  ;;  %v141_v61 = vmul.u32 %v139_v42, %v115_v37 }
  0xb2   :  { %v318_v49 = vsel %vm316_vm14, %v317_v43, %v313_v29  ;;  %v121_v59 = vmul.u32 %v117_v47, %v116_v38  ;;  %v144_v63 = vmul.u32 %v140_v39, %v116_v38  ;;  %v119_v4 = vmul.u32 %v117_v47, %v115_v37 }
  0xb3   :  { %v319_v50 = vadd.s32 %v318_v49, %v314_v45  ;;  %v120_v58 = vmul.u32 %v118_v48, %v115_v37  ;;  %v145_v0 = vshll.u32 %v142_v51, 16  ;;  %v122_v6 = vmul.u32 %v118_v48, %v116_v38 }
  0xb4   :  { %v125_v10 = vshll.u32 %v121_v59, 16  ;;  %v147_v62 = vshll.u32 %v143_v57, 16  ;;  %v103_v16 = vsel %vm101_vm11, %v826_v7, 2102212464  ;;  %v82_v18 = vshrl.u32 %v723_v56, %v785_v13 }
  0xb5   :  { %v320_v3 = vadd.s32 536870912, %v319_v50  ;;  %v123_v9 = vshll.u32 %v120_v58, 16  ;;  %vm149_vm15 = vc.u32 %v141_v61, %v145_v0  ;;  %v151_v11 = vadd.s32 %v145_v0, %v141_v61 }
  0xb6   :  { %v150_v60 = vsel %vm149_vm15, 1, %v720_v1  ;;  %v102_v24 = vsel %vm98_vm10, %v82_v18, %v815_v41  ;;  %v104_v7 = vsel %vm100_vm12, %v818_v44, %v103_v16  ;;  %v124_v25 = vshrl.u32 %v120_v58, 16 }
  0xb7   :  { %v876_v46 = vshrl.u32 %v320_v3, 30  ;;  %vm127_vm0 = vc.u32 %v119_v4, %v123_v9  ;;  %v129_v52 = vadd.s32 %v123_v9, %v119_v4  ;;  %v152_v14 = vadd.s32 %v150_v60, %v144_v63 }
  0xb8   :  { %v128_v12 = vsel %vm127_vm0, 1, %v720_v1  ;;  %vm153_vm1 = vc.u32 %v151_v11, %v147_v62  ;;  %v146_v53 = vshrl.u32 %v142_v51, 16  ;;  %v126_v56 = vshrl.u32 %v121_v59, 16 }
  0xb9   :  { %v322_v15 = vshll.u32 %v876_v46, 30  ;;  %v130_v17 = vadd.s32 %v128_v12, %v122_v6  ;;  %vm131_vm2 = vc.u32 %v129_v52, %v125_v10  ;;  %v154_v20 = vsel %vm153_vm1, 1, %v720_v1 }
  0xba   :  { %v132_v19 = vsel %vm131_vm2, 1, %v720_v1  ;;  %v156_v2 = vadd.s32 %v154_v20, %v152_v14  ;;  %v148_v26 = vshrl.u32 %v143_v57, 16  ;;  %v105_v28 = vsel %vm99_vm13, %v102_v24, %v104_v7 }
  0xbb   :  { %v323_v21 = vsub.s32 %v319_v50, %v322_v15  ;;  %v134_v23 = vadd.s32 %v132_v19, %v130_v17  ;;  %v155_v34 = vadd.s32 %v151_v11, %v147_v62  ;;  %v159_v44 = vmul.u32 %v773_v54, %v105_v28 }
  0xbc   :  { %v157_v27 = vadd.s32 %v156_v2, %v146_v53  ;;  %v315_v38 = vadd.s32 %v840_v22, %v851_v8  ;;  %vm223_vm7 = vcmp.lt.s32.totalorder %v754_v31, 0  ;;  %v345_v6 = vsub.s32 4, %v876_v46 }
  0xbd   :  { %vm324_vm3 = vcmp.lt.s32.totalorder %v323_v21, 0  ;;  %v325_v5 = vsub.s32 0, %v323_v21  ;;  %v135_v13 = vadd.s32 %v134_v23, %v124_v25  ;;  %vm906_vm8 = vcmp.le.f32.partialorder %v221_v33, 0.7853982 }
  0xbe   :  { %v158_v41 = vadd.s32 %v157_v27, %v148_v26  ;;  %v346_v60 = vsel %vm223_vm7, %v345_v6, %v876_v46  ;;  %vm68_vm10 = vcmp.lt.s32.totalorder %v756_v32, 0  ;;  %vm919_vm13 = vcmp.le.f32.partialorder %v66_v35, 0.7853982 }
  0xbf   :  { %v326_v1 = vsel %vm324_vm3, %v325_v5, %v323_v21  ;;  %v136_v30 = vadd.s32 %v135_v13, %v126_v56  ;;  %vm364_vm2 = vweird.f32 %v754_v31 }
  0xc0   :  { %v327_v29 = vclz %v326_v1  ;;  %v162_v37 = vadd.s32 1, %v158_v41 }
  0xc1   :  { %vm161_vm4 = vc.u32 %v136_v30, %v155_v34  ;;  %v160_v16 = vadd.s32 %v155_v34, %v136_v30 }
  0xc2   :  { %v696_v36 = vadd.s32 4294967294, %v327_v29  ;;  %v163_v42 = vsel %vm161_vm4, %v162_v37, %v158_v41 }
  0xc3   :  { %v164_v55 = vadd.s32 %v163_v42, %v159_v44 }
  0xc4   :  { %vm697_vm5 = vcmp.lt.s32.totalorder %v696_v36, 0 }
  0xc5   :  { %v330_v43 = vsel %vm697_vm5, 0, %v696_v36  ;;  %v165_v40 = vadd.s32 536870912, %v164_v55 }
  0xc6   :  { %v331_v39 = vsub.s32 32, %v330_v43  ;;  %v335_v45 = vsub.s32 4294967266, %v330_v43  ;;  %v332_v47 = vshll.u32 %v323_v21, %v330_v43  ;;  %v348_v21 = vsel %vm906_vm8, 0, %v346_v60 }
  0xc7   :  { %v899_v51 = vshrl.u32 %v165_v40, 30  ;;  %v365_v56 = vadd.s32 3, %v348_v21  ;;  %v676_v1 = vand.u32 3, %v348_v21 }
  0xc8   :  { %v333_v48 = vshrl.u32 %v315_v38, %v331_v39  ;;  %v336_v49 = vadd.s32 127, %v335_v45 }
  0xc9   :  { %v167_v58 = vshll.u32 %v899_v51, 30  ;;  %v366_v41 = vand.u32 3, %v365_v56  ;;  %vm677_vm11 = vcmp.lt.s32.totalorder %v676_v1, 2  ;;  %vm678_vm12 = vcmp.eq.s32.totalorder %v676_v1, 0 }
  0xca   :  { %v334_v57 = vor.u32 %v333_v48, %v332_v47  ;;  %v337_v50 = vshll.u32 %v336_v49, 23  ;;  %vm681_vm0 = vcmp.eq.s32.totalorder %v676_v1, 2  ;;  %v190_v45 = vsub.s32 4, %v899_v51 }
  0xcb   :  { %v168_v59 = vsub.s32 %v164_v55, %v167_v58  ;;  %vm367_vm14 = vcmp.lt.s32.totalorder %v366_v41, 2  ;;  %vm371_vm15 = vcmp.eq.s32.totalorder %v366_v41, 2  ;;  %vm368_vm1 = vcmp.eq.s32.totalorder %v366_v41, 0 }
  0xcc   :  { %v338_v54 = vor.u32 4788187, %v337_v50  ;;  %v341_v63 = vcvt.s32.f32 %v334_v57 }
  0xcd   :  { %vm169_vm6 = vcmp.lt.s32.totalorder %v168_v59, 0  ;;  %v170_v0 = vsub.s32 0, %v168_v59 }
  0xce   :  { %v339_v61 = vand.u32 2147483647, %v338_v54 }
  0xcf   :  { %v171_v22 = vsel %vm169_vm6, %v170_v0, %v168_v59 }
  0xd0   :  { %v342_v3 = vmul.f32 %v341_v63, %v339_v61  ;;  %v172_v4 = vclz %v171_v22 }
  0xd2   :  { %v343_v8 = vxor.u32 2147483648, %v342_v3  ;;  %v693_v62 = vadd.s32 4294967294, %v172_v4 }
  0xd4   :  { %v344_v10 = vsel %vm223_vm7, %v343_v8, %v342_v3  ;;  %vm694_vm9 = vcmp.lt.s32.totalorder %v693_v62, 0 }
  0xd5   :  { %v347_v11 = vsel %vm906_vm8, %v754_v31, %v344_v10  ;;  %v175_v12 = vsel %vm694_vm9, 0, %v693_v62  ;;  %v191_v31 = vsel %vm68_vm10, %v190_v45, %v899_v51  ;;  %vm209_vm9 = vweird.f32 %v756_v32 }
  0xd6   :  { %v349_v52 = vmul.f32 %v347_v11, %v347_v11  ;;  %v176_v17 = vsub.s32 32, %v175_v12  ;;  %v180_v18 = vsub.s32 4294967266, %v175_v12  ;;  %v177_v23 = vshll.u32 %v168_v59, %v175_v12 }
  0xd7   :  { %v193_v3 = vsel %vm919_vm13, 0, %v191_v31 }
  0xd8   :  { %v350_v14 = vmul.f32 -0.001358992, %v349_v52  ;;  %v357_v15 = vmul.f32 -0.00019511016, %v349_v52  ;;  %v178_v20 = vshrl.u32 %v160_v16, %v176_v17  ;;  %v181_v2 = vadd.s32 127, %v180_v18 }
  0xd9   :  { %v210_v9 = vadd.s32 3, %v193_v3  ;;  %v522_v60 = vand.u32 3, %v193_v3 }
  0xda   :  { %v351_v33 = vadd.f32 0.041655596, %v350_v14  ;;  %v358_v19 = vadd.f32 0.008332121, %v357_v15  ;;  %v179_v25 = vor.u32 %v178_v20, %v177_v23  ;;  %v182_v53 = vshll.u32 %v181_v2, 23 }
  0xdb   :  { %v211_v12 = vand.u32 3, %v210_v9  ;;  %vm523_vm3 = vcmp.lt.s32.totalorder %v522_v60, 2  ;;  %vm524_vm4 = vcmp.eq.s32.totalorder %v522_v60, 0  ;;  %vm527_vm8 = vcmp.eq.s32.totalorder %v522_v60, 2 }
  0xdc   :  { %v352_v24 = vmul.f32 %v351_v33, %v349_v52  ;;  %v359_v7 = vmul.f32 %v358_v19, %v349_v52  ;;  %v183_v13 = vor.u32 4788187, %v182_v53  ;;  %v186_v29 = vcvt.s32.f32 %v179_v25 }
  0xdd   :  { %vm212_vm5 = vcmp.lt.s32.totalorder %v211_v12, 2  ;;  %vm213_vm6 = vcmp.eq.s32.totalorder %v211_v12, 0  ;;  %vm216_vm7 = vcmp.eq.s32.totalorder %v211_v12, 2 }
  0xde   :  { %v353_v5 = vadd.f32 -0.4999988, %v352_v24  ;;  %v360_v46 = vadd.f32 -0.16666654, %v359_v7  ;;  %v184_v28 = vand.u32 2147483647, %v183_v13 }
  0xe0   :  { %v354_v26 = vmul.f32 %v353_v5, %v349_v52  ;;  %v361_v27 = vmul.f32 %v360_v46, %v349_v52  ;;  %v187_v36 = vmul.f32 %v186_v29, %v184_v28 }
  0xe2   :  { %v355_v30 = vadd.f32 1.0, %v354_v26  ;;  %v362_v34 = vadd.f32 1.0, %v361_v27  ;;  %v188_v43 = vxor.u32 2147483648, %v187_v36 }
  0xe4   :  { %v363_v37 = vmul.f32 %v362_v34, %v347_v11  ;;  %v372_v44 = vxor.u32 2147483648, %v355_v30  ;;  %v189_v39 = vsel %vm68_vm10, %v188_v43, %v187_v36 }
  0xe5   :  { %v192_v35 = vsel %vm919_vm13, %v756_v32, %v189_v39 }
  0xe6   :  { %v369_v55 = vxor.u32 2147483648, %v363_v37  ;;  %v373_v38 = vsel %vm371_vm15, %v372_v44, %v363_v37  ;;  %v683_v48 = vsel %vm681_vm0, %v372_v44, %v363_v37  ;;  %v194_v50 = vmul.f32 %v192_v35, %v192_v35 }
  0xe8   :  { %v370_v40 = vsel %vm368_vm1, %v355_v30, %v369_v55  ;;  %v680_v47 = vsel %vm678_vm12, %v355_v30, %v369_v55  ;;  %v195_v59 = vmul.f32 -0.001358992, %v194_v50  ;;  %v202_v61 = vmul.f32 -0.00019511016, %v194_v50 }
  0xe9   :  { %v374_v49 = vsel %vm367_vm14, %v370_v40, %v373_v38  ;;  %v684_v57 = vsel %vm677_vm11, %v680_v47, %v683_v48 }
  0xea   :  { %v375_v58 = vsel %vm364_vm2, nan, %v374_v49  ;;  %v685_v54 = vsel %vm364_vm2, nan, %v684_v57  ;;  %v196_v63 = vadd.f32 0.041655596, %v195_v59  ;;  %v203_v0 = vadd.f32 0.008332121, %v202_v61 }
  0xeb   :  { %377 = vst [vmem:[%s951_s2 + $0x10] sm:$0xff] %v375_v58 }
  0xec   :  { %687 = vst [vmem:[%s951_s2 + $0x18] sm:$0xff] %v685_v54  ;;  %v197_v22 = vmul.f32 %v196_v63, %v194_v50  ;;  %v204_v8 = vmul.f32 %v203_v0, %v194_v50 }
  0xee   :  { %v198_v4 = vadd.f32 -0.4999988, %v197_v22  ;;  %v205_v6 = vadd.f32 -0.16666654, %v204_v8 }
  0xf0   :  { %v199_v10 = vmul.f32 %v198_v4, %v194_v50  ;;  %v206_v62 = vmul.f32 %v205_v6, %v194_v50 }
  0xf2   :  { %v200_v11 = vadd.f32 1.0, %v199_v10  ;;  %v207_v52 = vadd.f32 1.0, %v206_v62 }
  0xf4   :  { %v208_v14 = vmul.f32 %v207_v52, %v192_v35  ;;  %v217_v15 = vxor.u32 2147483648, %v200_v11 }
  0xf6   :  { %v214_v16 = vxor.u32 2147483648, %v208_v14  ;;  %v218_v17 = vsel %vm216_vm7, %v217_v15, %v208_v14  ;;  %v529_v33 = vsel %vm527_vm8, %v217_v15, %v208_v14 }
  0xf8   :  { %v215_v51 = vsel %vm213_vm6, %v200_v11, %v214_v16  ;;  %v526_v18 = vsel %vm524_vm4, %v200_v11, %v214_v16 }
  0xf9   :  { %v219_v19 = vsel %vm212_vm5, %v215_v51, %v218_v17  ;;  %v530_v20 = vsel %vm523_vm3, %v526_v18, %v529_v33 }
  0xfa   :  { %v220_v21 = vsel %vm209_vm9, nan, %v219_v19  ;;  %v531_v23 = vsel %vm209_vm9, nan, %v530_v20 }
  0xfb   :  { %376 = vst [vmem:[%s951_s2] sm:$0xff] %v220_v21 }
  0xfc   :  { %686 = vst [vmem:[%s951_s2 + $0x8] sm:$0xff] %v531_v23 }

</bundles_post_ra>
